<compile_context>
chip_gen: v5e
topology: v5e:2x2
jax: 0.10.0
libtpu: 0.0.40
codegen_flags: <defaults>
</compile_context>

<pallas_src>
import functools

import jax
import jax.numpy as jnp
from jax.experimental import pallas as pl
from jax.experimental.pallas import tpu as pltpu


def _distinctive_loss_kernel(x_ref, y_ref, labels_ref, out_ref, *, batch, block_b):
    i = pl.program_id(0)

    labels = labels_ref[...]                                  # (TB, 1) int32
    tb, c = x_ref.shape

    # Bool label mask shared by both logit sets (no float one-hot: saves the
    # astype + one multiply per element on the VALU).  Labels assumed in [0, C).
    class_ids = jax.lax.broadcasted_iota(jnp.int32, (tb, c), 1)
    label_mask = class_ids == labels                          # (TB, C) bool

    def _nll(ref):
        # Cast per use so the two (TB, C) f32 copies are never live together.
        v = ref[...].astype(jnp.float32)                      # (TB, C) f32
        m = jnp.max(v, axis=-1, keepdims=True)
        lse = m + jnp.log(jnp.sum(jnp.exp(v - m), axis=-1, keepdims=True))
        label_logit = jnp.sum(jnp.where(label_mask, v, 0.0), axis=-1, keepdims=True)
        return lse - label_logit                              # (TB, 1)

    nll_sum = _nll(x_ref) + _nll(y_ref)                       # both CE terms fused

    # Mask rows past the real batch (ragged last block).  Keep this a select
    # (jnp.where), NOT a multiply-by-mask, so NaN/Inf from padded garbage rows
    # can never propagate into the reduction.
    row = jax.lax.broadcasted_iota(jnp.int32, (tb, 1), 0) + i * block_b
    partial = jnp.sum(jnp.where(row < batch, nll_sum, 0.0))

    # Lane-dense, unmasked (8, 128) store of this block's partial sum; keeps the
    # batch grid axis fully parallel (no resident scalar accumulator).
    out_ref[...] = jnp.full(out_ref.shape, partial, dtype=jnp.float32)


def _pick_block_b(batch, num_classes, itemsize):
    """Batch tile sized by bytes moved per grid step (~2 MiB per logit input).

    ~2 MiB native-dtype tiles already sit at ~85% of the HBM roofline while
    keeping the (triple-buffered) live set far under every generation's scoped
    VMEM default and v7x's 64 MiB physical VMEM.  If the whole batch fits one
    tile, split it in two so v7x's second TensorCore gets work.
    """
    sub = max(8, 32 // max(1, itemsize))          # sublane packing: 8 f32 / 16 bf16
    tile_budget = 2 * 1024 * 1024                 # native bytes per logit tile
    row_bytes = max(1, num_classes * itemsize)
    tb = max(sub, (tile_budget // row_bytes) // sub * sub)
    if batch <= tb:
        half = -(-batch // 2)                     # cdiv(batch, 2)
        tb = -(-half // sub) * sub                # round up to sublane multiple
        if tb >= batch:
            tb = batch                            # too small to split
    return tb


def _vmem_limit_bytes(tb, num_classes, itemsize):
    """Scoped-VMEM request sized from the real live set (plus 1.5x margin)."""
    native_tile = tb * num_classes * itemsize
    f32_tile = tb * num_classes * 4
    # 2 logit inputs x up-to-3 pipeline buffers (native dtype) + ~2 full f32
    # in-kernel intermediates live at the peak + labels/output/misc slack.
    live = 2 * 3 * native_tile + 2 * f32_tile + (2 << 20)
    return int(min(max(live * 3 // 2, 16 << 20), 56 << 20))


def distinctive_loss(cls_x: jax.Array, cls_y: jax.Array, labels: jax.Array,
                     *, block_b: int | None = None) -> jax.Array:
    """DistinctiveLoss.forward: CE(cls_x, labels) + CE(cls_y, labels), mean-reduced.

    cls_x, cls_y: (B, C) float logits (f32 or bf16, passed in native dtype)
    labels:       (B,)   integer class indices in [0, C)
    returns scalar float32 loss
    """
    B, C = cls_x.shape
    assert cls_y.shape == (B, C)
    labels2d = labels.astype(jnp.int32).reshape(B, 1)

    # TODO(synk): for very large C (big vocab) add a second grid axis over C
    # with an online (flash-style) logsumexp; current design keeps full C rows
    # resident per block.
    itemsize = cls_x.dtype.itemsize
    tb = block_b if block_b is not None else _pick_block_b(B, C, itemsize)
    nb = pl.cdiv(B, tb)

    # 3-deep buffering on the two logit streams only when there are enough grid
    # steps for it to matter (keeps HBM saturated with shorter per-step compute).
    logit_pipeline = pl.Buffered(3) if nb >= 3 else None

    kernel = functools.partial(_distinctive_loss_kernel, batch=B, block_b=tb)
    partials = pl.pallas_call(
        kernel,
        out_shape=jax.ShapeDtypeStruct((nb, 8, 128), jnp.float32),
        grid=(nb,),
        in_specs=[
            pl.BlockSpec((tb, C), lambda i: (i, 0), pipeline_mode=logit_pipeline),
            pl.BlockSpec((tb, C), lambda i: (i, 0), pipeline_mode=logit_pipeline),
            pl.BlockSpec((tb, 1), lambda i: (i, 0)),
        ],
        out_specs=pl.BlockSpec((1, 8, 128), lambda i: (i, 0, 0)),
        compiler_params=pltpu.CompilerParams(
            dimension_semantics=("parallel",),
            vmem_limit_bytes=_vmem_limit_bytes(tb, C, itemsize),
        ),
        cost_estimate=pl.CostEstimate(
            flops=10 * B * C,
            transcendentals=2 * B * C,
            bytes_accessed=2 * B * C * itemsize + B * 4 + nb * 8 * 128 * 4,
        ),
    )(cls_x, cls_y, labels2d)

    # (sum_x + sum_y) / B == mean CE(x) + mean CE(y); multiply by static 1/B.
    return partials[:, 0, 0].sum() * (1.0 / B)


if __name__ == "__main__":
    key = jax.random.PRNGKey(0)
    kx, ky, kl = jax.random.split(key, 3)

    # reference: plain-JAX equivalent of torch CrossEntropyLoss (mean) x2
    def _ce(logits, lbl):
        logp = jax.nn.log_softmax(logits.astype(jnp.float32), axis=-1)
        return -jnp.mean(logp[jnp.arange(logits.shape[0]), lbl])

    # --- small f32 case (single block) -------------------------------------
    B, C = 8, 32
    cls_x = jax.random.normal(kx, (B, C), dtype=jnp.float32)
    cls_y = jax.random.normal(ky, (B, C), dtype=jnp.float32)
    labels = jax.random.randint(kl, (B,), 0, C, dtype=jnp.int32)

    loss = distinctive_loss(cls_x, cls_y, labels)
    jax.block_until_ready(loss)
    ref = _ce(cls_x, labels) + _ce(cls_y, labels)
    assert jnp.allclose(loss, ref, atol=1e-5, rtol=1e-5), (loss, ref)

    # --- bf16 logits path (in-kernel cast, no wrapper-side f32 HBM copy) ----
    loss_bf16 = distinctive_loss(
        cls_x.astype(jnp.bfloat16), cls_y.astype(jnp.bfloat16), labels
    )
    jax.block_until_ready(loss_bf16)
    ref_bf16 = _ce(cls_x.astype(jnp.bfloat16), labels) + _ce(
        cls_y.astype(jnp.bfloat16), labels
    )
    assert jnp.allclose(loss_bf16, ref_bf16, atol=5e-2, rtol=5e-2), (loss_bf16, ref_bf16)

    # --- ragged batch + class count not a multiple of 128 (masking check) ---
    B2, C2 = 13, 100
    k2x, k2y, k2l = jax.random.split(jax.random.PRNGKey(1), 3)
    x2 = jax.random.normal(k2x, (B2, C2), dtype=jnp.float32)
    y2 = jax.random.normal(k2y, (B2, C2), dtype=jnp.float32)
    l2 = jax.random.randint(k2l, (B2,), 0, C2, dtype=jnp.int32)
    loss2 = distinctive_loss(x2, y2, l2)
    jax.block_until_ready(loss2)
    ref2 = _ce(x2, l2) + _ce(y2, l2)
    assert jnp.allclose(loss2, ref2, atol=1e-5, rtol=1e-5), (loss2, ref2)

    # --- multi-block grid (exercises the Buffered(3) logit pipeline) --------
    B3, C3 = 40, 64
    k3x, k3y, k3l = jax.random.split(jax.random.PRNGKey(2), 3)
    x3 = jax.random.normal(k3x, (B3, C3), dtype=jnp.float32)
    y3 = jax.random.normal(k3y, (B3, C3), dtype=jnp.float32)
    l3 = jax.random.randint(k3l, (B3,), 0, C3, dtype=jnp.int32)
    loss3 = distinctive_loss(x3, y3, l3, block_b=8)   # 5 grid steps
    jax.block_until_ready(loss3)
    ref3 = _ce(x3, l3) + _ce(y3, l3)
    assert jnp.allclose(loss3, ref3, atol=1e-5, rtol=1e-5), (loss3, ref3)

    print("KERNEL_OK")
</pallas_src>

<mosaic_0001>
module attributes {stable_mosaic.version = 11 : i64} {
  func.func @_distinctive_loss_kernel(%arg0: i32, %arg1: memref<8x32xf32, #tpu.memory_space<vmem>>, %arg2: memref<8x32xf32, #tpu.memory_space<vmem>>, %arg3: memref<8x1xi32, #tpu.memory_space<vmem>>, %arg4: memref<1x8x128xf32, #tpu.memory_space<vmem>>) attributes {dimension_semantics = [#tpu.dimension_semantics<parallel>], iteration_bounds = array<i64: 1>, scalar_prefetch = 0 : i64, scratch_operands = 0 : i64, tpu.core_type = #tpu.core_type<tc>, window_params = [{transform_indices = @transform_0, window_bounds = array<i64: 8, 32>}, {transform_indices = @transform_1, window_bounds = array<i64: 8, 32>}, {transform_indices = @transform_2, window_bounds = array<i64: 8, 1>}, {transform_indices = @transform_3, window_bounds = array<i64: 1, 8, 128>}]} {
    %c0 = arith.constant 0 : index
    %c0_0 = arith.constant 0 : index
    %0 = vector.load %arg3[%c0, %c0_0] : memref<8x1xi32, #tpu.memory_space<vmem>>, vector<8x1xi32>
    %1 = tpu.iota {dimensions = array<i32: 1>} : vector<8x32xi32>
    %2 = vector.broadcast %0 : vector<8x1xi32> to vector<8x32xi32>
    %3 = arith.cmpi eq, %1, %2 : vector<8x32xi32>
    %c0_1 = arith.constant 0 : index
    %c0_2 = arith.constant 0 : index
    %4 = vector.load %arg1[%c0_1, %c0_2] : memref<8x32xf32, #tpu.memory_space<vmem>>, vector<8x32xf32>
    %cst = arith.constant dense<0xFF800000> : vector<8xf32>
    %5 = vector.multi_reduction <maximumf>, %4, %cst [1] : vector<8x32xf32> to vector<8xf32>
    %6 = vector.shape_cast %5 : vector<8xf32> to vector<8x1xf32>
    %7 = vector.broadcast %6 : vector<8x1xf32> to vector<8x32xf32>
    %8 = arith.subf %4, %7 : vector<8x32xf32>
    %9 = math.exp %8 : vector<8x32xf32>
    %cst_3 = arith.constant dense<0.000000e+00> : vector<8xf32>
    %10 = vector.multi_reduction <add>, %9, %cst_3 [1] : vector<8x32xf32> to vector<8xf32>
    %11 = vector.shape_cast %10 : vector<8xf32> to vector<8x1xf32>
    %12 = math.log %11 : vector<8x1xf32>
    %13 = arith.addf %6, %12 : vector<8x1xf32>
    %cst_4 = arith.constant 0.000000e+00 : f32
    %14 = vector.broadcast %cst_4 : f32 to vector<8x32xf32>
    %15 = arith.select %3, %4, %14 : vector<8x32xi1>, vector<8x32xf32>
    %cst_5 = arith.constant dense<0.000000e+00> : vector<8xf32>
    %16 = vector.multi_reduction <add>, %15, %cst_5 [1] : vector<8x32xf32> to vector<8xf32>
    %17 = vector.shape_cast %16 : vector<8xf32> to vector<8x1xf32>
    %18 = arith.subf %13, %17 : vector<8x1xf32>
    %c0_6 = arith.constant 0 : index
    %c0_7 = arith.constant 0 : index
    %19 = vector.load %arg2[%c0_6, %c0_7] : memref<8x32xf32, #tpu.memory_space<vmem>>, vector<8x32xf32>
    %cst_8 = arith.constant dense<0xFF800000> : vector<8xf32>
    %20 = vector.multi_reduction <maximumf>, %19, %cst_8 [1] : vector<8x32xf32> to vector<8xf32>
    %21 = vector.shape_cast %20 : vector<8xf32> to vector<8x1xf32>
    %22 = vector.broadcast %21 : vector<8x1xf32> to vector<8x32xf32>
    %23 = arith.subf %19, %22 : vector<8x32xf32>
    %24 = math.exp %23 : vector<8x32xf32>
    %cst_9 = arith.constant dense<0.000000e+00> : vector<8xf32>
    %25 = vector.multi_reduction <add>, %24, %cst_9 [1] : vector<8x32xf32> to vector<8xf32>
    %26 = vector.shape_cast %25 : vector<8xf32> to vector<8x1xf32>
    %27 = math.log %26 : vector<8x1xf32>
    %28 = arith.addf %21, %27 : vector<8x1xf32>
    %cst_10 = arith.constant 0.000000e+00 : f32
    %29 = vector.broadcast %cst_10 : f32 to vector<8x32xf32>
    %30 = arith.select %3, %19, %29 : vector<8x32xi1>, vector<8x32xf32>
    %cst_11 = arith.constant dense<0.000000e+00> : vector<8xf32>
    %31 = vector.multi_reduction <add>, %30, %cst_11 [1] : vector<8x32xf32> to vector<8xf32>
    %32 = vector.shape_cast %31 : vector<8xf32> to vector<8x1xf32>
    %33 = arith.subf %28, %32 : vector<8x1xf32>
    %34 = arith.addf %18, %33 : vector<8x1xf32>
    %35 = tpu.iota {dimensions = array<i32: 0>} : vector<8x1xi32>
    %c8_i32 = arith.constant 8 : i32
    %36 = arith.muli %arg0, %c8_i32 : i32
    %37 = vector.broadcast %36 : i32 to vector<8x1xi32>
    %38 = arith.addi %35, %37 : vector<8x1xi32>
    %c8_i32_12 = arith.constant 8 : i32
    %39 = vector.broadcast %c8_i32_12 : i32 to vector<8x1xi32>
    %40 = arith.cmpi slt, %38, %39 : vector<8x1xi32>
    %cst_13 = arith.constant 0.000000e+00 : f32
    %41 = vector.broadcast %cst_13 : f32 to vector<8x1xf32>
    %42 = arith.select %40, %34, %41 : vector<8x1xi1>, vector<8x1xf32>
    %43 = vector.shape_cast %42 : vector<8x1xf32> to vector<1x8x1xf32>
    %cst_14 = arith.constant dense<0.000000e+00> : vector<1xf32>
    %44 = vector.multi_reduction <add>, %43, %cst_14 [1, 2] : vector<1x8x1xf32> to vector<1xf32>
    %45 = vector.shape_cast %44 : vector<1xf32> to vector<1x1x1xf32>
    %46 = vector.extract %45[0, 0, 0] : f32 from vector<1x1x1xf32>
    %47 = vector.broadcast %46 : f32 to vector<1x8x128xf32>
    %c0_15 = arith.constant 0 : index
    %c0_16 = arith.constant 0 : index
    %c0_17 = arith.constant 0 : index
    %48 = vector.load %arg4[%c0_15, %c0_16, %c0_17] : memref<1x8x128xf32, #tpu.memory_space<vmem>>, vector<1x8x128xf32>
    tpu.vector_store %arg4[%c0_15, %c0_16, %c0_17], %47 {strides = array<i32>} : memref<1x8x128xf32, #tpu.memory_space<vmem>>, vector<1x8x128xf32>,
    return
  }
  func.func @transform_0(%arg0: i32) -> (i32, i32) {
    %c0_i32 = arith.constant 0 : i32
    %c0_i32_0 = arith.constant 0 : i32
    return %arg0, %c0_i32 : i32, i32
  }
  func.func @transform_1(%arg0: i32) -> (i32, i32) {
    %c0_i32 = arith.constant 0 : i32
    %c0_i32_0 = arith.constant 0 : i32
    return %arg0, %c0_i32 : i32, i32
  }
  func.func @transform_2(%arg0: i32) -> (i32, i32) {
    %c0_i32 = arith.constant 0 : i32
    %c0_i32_0 = arith.constant 0 : i32
    return %arg0, %c0_i32 : i32, i32
  }
  func.func @transform_3(%arg0: i32) -> (i32, i32, i32) {
    %c0_i32 = arith.constant 0 : i32
    %c0_i32_0 = arith.constant 0 : i32
    %c0_i32_1 = arith.constant 0 : i32
    return %arg0, %c0_i32, %c0_i32_0 : i32, i32, i32
  }
}

</mosaic_0001>

<bundles_post_ra>
// kernel: tpu_custom_call.1
= control target key start
LH: loop header
LB: loop body
LE: loop exit
PB: predicated region body
PF: predicated region fallthrough
CT: control target
= control target key end

     0   :  { %8 = vsyncpa [#allocation3], 0  ;;  %s221_s0 = inlined_call_operand.vmem [shape: f32[8,32], index: 0, kind: input, shape index: {}]   ;;  %s222_s1 = inlined_call_operand.hbm [shape: f32[8,32], index: 1, kind: input, shape index: {}]   ;;  %s223_s2 = inlined_call_operand.vmem [shape: s32[8,1], index: 2, kind: input, shape index: {}]   ;;  %s224_s3 = inlined_call_operand.hbm [shape: f32[1,8,128], index: 3, kind: output, shape index: {}]  }
   0x1   :  { %9 = vsyncpa [#allocation4], 0  ;;  %s17_s14 = sshll.u32 %s222_s1, 4  ;;  %s178_s15 = smov [#allocation2]   ;;  %s18_s14 = int_to_ptr.hbm [resolvable:$true] %s17_s14 }
   0x2   :  { %s19_s16 = sshll.u32 %s178_s15, 4  ;;  %s20_s16 = int_to_ptr.vmem [resolvable:$true] %s19_s16 }
   0x3   :  { %22 = dma.hbm_to_vmem [thread:$0]  %s18_s14, 128, %s20_s16, [#allocation3]  }
   0x4   :  { %174 = dma.done.wait [#allocation3], 128  }
   0x5   :  { %175 = vsyncadd [#allocation3], 4294967168  ;;  %v179_v0 = vmov 0   ;;  %vm37_vm0 = vcmask 261120   ;;  %v36_v1 = vld [vmem:[%s221_s0] sm:$0xff]  ;;  %v30_v6 = vlaneseq  ;;  %vm81_vm2 = vcmask 7168  }
   0x6   :  { %116 = vset.pattern.permute.xlu1 %v179_v0  ;;  %117 = vset.pattern.permute.xlu0 %v179_v0  ;;  %v29_v2 = vld [vmem:[%s223_s2] sm:$0xff]  ;;  %v38_v3 = vsel %vm37_vm0, %v36_v1, -inf  ;;  %s180_s0 = smov [#allocation5]   ;;  %s101_s22 = sshll.u32 %s224_s3, 4  ;;  %s102_s22 = int_to_ptr.hbm [resolvable:$true] %s101_s22 }
   0x7   :  { %33 = vperm.xlu1 %116, %v29_v2   ;;  %39 = vmax.xlane.f32.xlu0 %v38_v3  ;;  %v55_v4 = vld [vmem:[#allocation2] sm:$0xff]  ;;  %v31_v7 = vand.u32 127, %v30_v6  ;;  %s99_s1 = sshll.u32 %s180_s0, 4  ;;  %s100_s1 = int_to_ptr.vmem [resolvable:$true] %s99_s1 }
   0x8   :  { %v56_v5 = vsel %vm37_vm0, %v55_v4, -inf }
   0xf   :  { %57 = vmax.xlane.f32.xlu0 %v56_v5 }
  0x79   :  { %v34_v8 = vpop.permute.xlu1 %33 }
  0x7a   :  { %vm35_vm1 = vcmp.eq.s32.totalorder %v31_v7, %v34_v8  ;;  %v40_v9 = vpop.xlane.xlu0 %39 }
  0x7b   :  { %v68_v10 = vsel %vm35_vm1, %v55_v4, 0.0  ;;  %v41_v11 = vsub.f32 %v36_v1, %v40_v9  ;;  %v50_v21 = vsel %vm35_vm1, %v36_v1, 0.0 }
  0x7c   :  { %v69_v12 = vsel %vm37_vm0, %v68_v10, 0.0  ;;  %v51_v22 = vsel %vm37_vm0, %v50_v21, 0.0 }
  0x7d   :  { %70 = vadd.xlane.f32.xlu0 %v69_v12  ;;  %v42_v13 = vmul.f32 1.442695, %v41_v11 }
  0x7f   :  { %118 = vpow2.f32 %v42_v13 }
  0x82   :  { %v58_v14 = vpop.xlane.xlu0 %57 }
  0x83   :  { %v59_v15 = vsub.f32 %v55_v4, %v58_v14 }
  0x85   :  { %v119_v16 = vpop.eup %118  ;;  %v60_v17 = vmul.f32 1.442695, %v59_v15 }
  0x86   :  { %v44_v18 = vsel %vm37_vm0, %v119_v16, 0.0 }
  0x87   :  { %120 = vpow2.f32 %v60_v17  ;;  %45 = vadd.xlane.f32.xlu1 %v44_v18 }
  0x8d   :  { %v121_v19 = vpop.eup %120 }
  0x8e   :  { %v62_v20 = vsel %vm37_vm0, %v121_v19, 0.0 }
  0x8f   :  { %63 = vadd.xlane.f32.xlu2 %v62_v20 }
  0x97   :  { %52 = vadd.xlane.f32.xlu2 %v51_v22 }
  0xf0   :  { %v71_v30 = vpop.xlane.xlu0 %70 }
  0xfa   :  { %v46_v23 = vpop.xlane.xlu1 %45 }
  0xfb   :  { %122 = vlog2.f32 %v46_v23 }
 0x101   :  { %v123_v25 = vpop.eup %122 }
 0x102   :  { %v64_v24 = vpop.xlane.xlu2 %63  ;;  %v48_v26 = vmul.f32 0.6931472, %v123_v25 }
 0x103   :  { %124 = vlog2.f32 %v64_v24 }
 0x104   :  { %v49_v31 = vadd.f32 %v48_v26, %v40_v9 }
 0x109   :  { %v125_v27 = vpop.eup %124 }
 0x10a   :  { %v66_v28 = vmul.f32 0.6931472, %v125_v27  ;;  %v53_v29 = vpop.xlane.xlu2 %52 }
 0x10b   :  { %v54_v33 = vsub.f32 %v49_v31, %v53_v29 }
 0x10c   :  { %v67_v32 = vadd.f32 %v66_v28, %v58_v14 }
 0x10e   :  { %v72_v34 = vsub.f32 %v67_v32, %v71_v30 }
 0x110   :  { %v73_v35 = vadd.f32 %v72_v34, %v54_v33 }
 0x112   :  { %v82_v36 = vsel %vm81_vm2, %v73_v35, 0.0 }
 0x113   :  { %83 = vadd.xlane.f32.xlu2 %v82_v36 }
 0x186   :  { %v84_v37 = vpop.xlane.xlu2 %83 }
 0x187   :  { %v85_v38 = vrot.slane %v84_v37, 4 }
 0x189   :  { %v86_v39 = vadd.f32 %v85_v38, %v84_v37 }
 0x18b   :  { %v87_v40 = vrot.slane %v86_v39, 2 }
 0x18d   :  { %v88_v41 = vadd.f32 %v87_v40, %v86_v39 }
 0x18f   :  { %v89_v42 = vrot.slane %v88_v41, 1 }
 0x191   :  { %v90_v43 = vadd.f32 %v89_v42, %v88_v41 }
 0x193   :  { %111 = vpush %v90_v43 }
 0x1c4   :  { %s112_s23 = spop %111 }
 0x1c5   :  { %v92_v44 = vstv %s112_s23 }
 0x1c6   :  { %93 = vst [vmem:[#allocation5] sm:$0xff] %v92_v44 }
 0x1c7   :  { %104 = dma.vmem_to_hbm [thread:$0]  %s100_s1, 128, %s102_s22, [#allocation4]  }
 0x1c8   :  { %176 = dma.done.wait [#allocation4], 128  }
 0x1c9   :  { %177 = vsyncadd [#allocation4], 4294967168 }
 0x1ca   :  { %109 = vsyncpa [#allocation3], 1 }
 0x1cb   :  { %110 = vsyncpa [#allocation4], 1 }

</bundles_post_ra>
